<compile_context>
chip_gen: v7x
topology: tpu7x:2x2x1
jax: 0.10.0
libtpu: 0.0.40
codegen_flags: <defaults>
</compile_context>

<pallas_src>
import functools
import re

import jax
import jax.numpy as jnp
from jax.experimental import pallas as pl
from jax.experimental.pallas import tpu as pltpu


def _round_up(x, m):
    return ((x + m - 1) // m) * m


def _tpu_generation():
    """Best-effort TPU generation from device_kind (e.g. 'TPU v6e' -> 6). None if unknown."""
    try:
        kind = jax.devices()[0].device_kind.lower()
    except Exception:
        return None
    if "tpu" not in kind:
        return None
    m = re.search(r"(\d+)", kind)
    return int(m.group(1)) if m else None


def _mlp_kernel(x_ref, *refs, act_dtype, first_layer_on_vpu):
    """refs = (w0, b0, w1, b1, ..., wL, bL, o_ref).

    x_ref: [d_in, tile]        (feature-major: batch on the 128-lane axis, act_dtype)
    w_i:   [d_out_i, d_in_i]   (torch nn.Linear weight convention, act_dtype)
    b_i:   [d_out_i, 1]        (f32; added to the f32 accumulator)
    o_ref: [d_out, tile]
    """
    o_ref = refs[-1]
    param_refs = refs[:-1]
    n_layers = len(param_refs) // 2

    h = x_ref[...]  # act_dtype
    for i in range(n_layers):
        w = param_refs[2 * i][...]
        b = param_refs[2 * i + 1][...]
        if i == 0 and first_layer_on_vpu:
            # Tiny-K first layer on the VPU: d_in broadcast-FMAs instead of an MXU pass.
            hf = h.astype(jnp.float32)
            wf = w.astype(jnp.float32)
            d_in = wf.shape[1]
            z = wf[:, 0:1] * hf[0:1, :]
            for j in range(1, d_in):
                z = z + wf[:, j : j + 1] * hf[j : j + 1, :]
            z = z + b
        else:
            # Native bf16 MXU path when act_dtype=bf16; f32 accumulation either way.
            z = jnp.dot(w, h, preferred_element_type=jnp.float32) + b
        if i < n_layers - 1:  # tanh on every layer except the output layer
            if act_dtype != jnp.float32:
                z = z.astype(act_dtype)  # bf16 tanh on v6e/v7x EUP
            h = jnp.tanh(z)
        else:
            h = z
    o_ref[...] = h.astype(o_ref.dtype)


def neural_net_forward(x, params, *, tile_batch=8192, use_bf16_activations=None):
    """Fused MLP forward.

    x:      [N, input_dimension] float32 (batch-major, like the PyTorch module).
    params: list of (W [d_out, d_in], b [d_out, 1]) tuples in layer order
            (torch.nn.Linear .weight / .bias[:, None] layout).
    use_bf16_activations: None -> auto (True on v6e/v7x, False on v5e/unknown).
            Keep False whenever f32-exact results are required.
    """
    n, d_in = x.shape
    d_out = params[-1][0].shape[0]
    neurons = max(w.shape[0] for w, _ in params)

    gen = _tpu_generation()
    if use_bf16_activations is None:
        use_bf16_activations = gen is not None and gen >= 6
    act_dtype = jnp.bfloat16 if use_bf16_activations else jnp.float32
    act_bytes = 2 if use_bf16_activations else 4

    # Lane-dense batch tile: multiple of 128, no larger than the (rounded-up) batch.
    tile = _round_up(min(int(tile_batch), _round_up(n, 128)), 128)

    # VMEM guard: double-buffered I/O + a few live [neurons, tile] f32 intermediates
    # must stay well under the scoped-VMEM default (esp. v7x: 32 MiB scoped / 64 MiB).
    def _vmem_est(t):
        io = 2 * (d_in * act_bytes + d_out * 4) * t  # double-buffered input + output
        live = 4 * neurons * t * 4                   # live f32 activation buffers
        return io + live

    while tile > 128 and _vmem_est(tile) > 24 * 1024 * 1024:
        tile //= 2
    tile = max(128, _round_up(tile, 128))

    # Grid: one step per tile. Only force >=2 steps on 2-TensorCore parts (v7x) so
    # both cores get work; on single-TC v5e/v6e an extra padded step just serializes.
    n_steps = -(-n // tile)
    if gen is not None and gen >= 7:
        n_steps = max(n_steps, 2)
    n_pad = n_steps * tile

    # Feature-major input in the activation dtype: [d_in, n_pad].
    xt = jnp.transpose(x).astype(act_dtype)
    if n_pad != n:
        xt = jnp.pad(xt, ((0, 0), (0, n_pad - n)))
    # TODO(synk): for very large N, keep collocation points feature-major upstream to
    # avoid this transpose+pad HBM round trip entirely.

    flat_params = []
    in_specs = [pl.BlockSpec((d_in, tile), lambda i: (0, i))]
    flops = 0
    transcendentals = 0
    bytes_accessed = xt.size * act_bytes + n_pad * d_out * 4
    for li, (w, b) in enumerate(params):
        w = w.astype(act_dtype)          # pre-cast once (no per-step cast in kernel)
        b = b.astype(jnp.float32)        # bias added to the f32 accumulator
        flat_params.append(w)
        flat_params.append(b)
        # Whole (tiny) weights, constant block index -> VMEM-resident across steps.
        in_specs.append(pl.BlockSpec(w.shape, lambda i: (0, 0)))
        in_specs.append(pl.BlockSpec(b.shape, lambda i: (0, 0)))
        o_dim, i_dim = w.shape
        flops += 2 * n_pad * o_dim * i_dim + n_pad * o_dim
        if li < len(params) - 1:
            transcendentals += n_pad * o_dim
        bytes_accessed += w.size * act_bytes + b.size * 4

    out_spec = pl.BlockSpec((d_out, tile), lambda i: (0, i))

    kernel = functools.partial(
        _mlp_kernel, act_dtype=act_dtype, first_layer_on_vpu=(d_in <= 4)
    )

    out_t = pl.pallas_call(
        kernel,
        out_shape=jax.ShapeDtypeStruct((d_out, n_pad), x.dtype),
        grid=(n_steps,),
        in_specs=in_specs,
        out_specs=out_spec,
        compiler_params=pltpu.CompilerParams(dimension_semantics=("parallel",)),
        cost_estimate=pl.CostEstimate(
            flops=int(flops),
            transcendentals=int(transcendentals),
            bytes_accessed=int(bytes_accessed),
        ),
    )(xt, *flat_params)

    # Back to the module's [N, d_out] batch-major convention.
    return jnp.transpose(out_t[:, :n])


def init_params(key, input_dimension, output_dimension, n_hidden_layers, neurons):
    """PyTorch-style (uniform +-1/sqrt(fan_in)) init; W stored as [out, in], b as [out, 1]."""
    dims = [input_dimension] + [neurons] * n_hidden_layers + [output_dimension]
    params = []
    for i in range(len(dims) - 1):
        fan_in, fan_out = dims[i], dims[i + 1]
        key, kw, kb = jax.random.split(key, 3)
        bound = 1.0 / float(jnp.sqrt(jnp.float32(fan_in)))
        w = jax.random.uniform(kw, (fan_out, fan_in), jnp.float32, -bound, bound)
        b = jax.random.uniform(kb, (fan_out, 1), jnp.float32, -bound, bound)
        params.append((w, b))
    return params


def _reference_forward(x, params):
    h = x
    for i, (w, b) in enumerate(params):
        h = h @ w.T + b[:, 0]
        if i < len(params) - 1:
            h = jnp.tanh(h)
    return h


if __name__ == "__main__":
    # Module hyper-params consistent with a typical PINN setup (small demo shapes).
    input_dimension = 2
    output_dimension = 1
    n_hidden_layers = 4
    neurons = 32
    batch = 16

    key = jax.random.PRNGKey(0)
    key, kx = jax.random.split(key)
    x = jax.random.normal(kx, (batch, input_dimension), jnp.float32)

    params = init_params(key, input_dimension, output_dimension,
                         n_hidden_layers, neurons)

    ref = _reference_forward(x, params)

    # Exact (f32-activation) path: must match the f32 reference tightly.
    out_f32 = jax.block_until_ready(
        neural_net_forward(x, params, use_bf16_activations=False))
    assert out_f32.shape == (batch, output_dimension)
    assert jnp.allclose(out_f32, ref, atol=1e-5, rtol=1e-5)

    # Auto path (bf16 activations on v6e/v7x, f32 elsewhere): looser tolerance.
    out_auto = jax.block_until_ready(neural_net_forward(x, params))
    assert out_auto.shape == (batch, output_dimension)
    assert jnp.allclose(out_auto, ref, atol=5e-2, rtol=5e-2)

    print("KERNEL_OK")
</pallas_src>

<mosaic_0001>
module attributes {stable_mosaic.version = 11 : i64} {
  func.func @_mlp_kernel(%arg0: i32, %arg1: memref<2x128xf32, #tpu.memory_space<vmem>>, %arg2: memref<32x2xf32, #tpu.memory_space<vmem>>, %arg3: memref<32x1xf32, #tpu.memory_space<vmem>>, %arg4: memref<32x32xf32, #tpu.memory_space<vmem>>, %arg5: memref<32x1xf32, #tpu.memory_space<vmem>>, %arg6: memref<32x32xf32, #tpu.memory_space<vmem>>, %arg7: memref<32x1xf32, #tpu.memory_space<vmem>>, %arg8: memref<32x32xf32, #tpu.memory_space<vmem>>, %arg9: memref<32x1xf32, #tpu.memory_space<vmem>>, %arg10: memref<1x32xf32, #tpu.memory_space<vmem>>, %arg11: memref<1x1xf32, #tpu.memory_space<vmem>>, %arg12: memref<1x128xf32, #tpu.memory_space<vmem>>) attributes {dimension_semantics = [#tpu.dimension_semantics<parallel>], iteration_bounds = array<i64: 1>, scalar_prefetch = 0 : i64, scratch_operands = 0 : i64, tpu.core_type = #tpu.core_type<tc>, window_params = [{transform_indices = @transform_0, window_bounds = array<i64: 2, 128>}, {pipeline_mode = #tpu.pipeline_mode<synchronous>, transform_indices = @transform_1, window_bounds = array<i64: 32, 2>}, {pipeline_mode = #tpu.pipeline_mode<synchronous>, transform_indices = @transform_2, window_bounds = array<i64: 32, 1>}, {pipeline_mode = #tpu.pipeline_mode<synchronous>, transform_indices = @transform_3, window_bounds = array<i64: 32, 32>}, {pipeline_mode = #tpu.pipeline_mode<synchronous>, transform_indices = @transform_4, window_bounds = array<i64: 32, 1>}, {pipeline_mode = #tpu.pipeline_mode<synchronous>, transform_indices = @transform_5, window_bounds = array<i64: 32, 32>}, {pipeline_mode = #tpu.pipeline_mode<synchronous>, transform_indices = @transform_6, window_bounds = array<i64: 32, 1>}, {pipeline_mode = #tpu.pipeline_mode<synchronous>, transform_indices = @transform_7, window_bounds = array<i64: 32, 32>}, {pipeline_mode = #tpu.pipeline_mode<synchronous>, transform_indices = @transform_8, window_bounds = array<i64: 32, 1>}, {pipeline_mode = #tpu.pipeline_mode<synchronous>, transform_indices = @transform_9, window_bounds = array<i64: 1, 32>}, {pipeline_mode = #tpu.pipeline_mode<synchronous>, transform_indices = @transform_10, window_bounds = array<i64: 1, 1>}, {transform_indices = @transform_11, window_bounds = array<i64: 1, 128>}]} {
    %c0 = arith.constant 0 : index
    %c0_0 = arith.constant 0 : index
    %0 = vector.load %arg1[%c0, %c0_0] : memref<2x128xf32, #tpu.memory_space<vmem>>, vector<2x128xf32>
    %c0_1 = arith.constant 0 : index
    %c0_2 = arith.constant 0 : index
    %1 = vector.load %arg2[%c0_1, %c0_2] : memref<32x2xf32, #tpu.memory_space<vmem>>, vector<32x2xf32>
    %c0_3 = arith.constant 0 : index
    %c0_4 = arith.constant 0 : index
    %2 = vector.load %arg3[%c0_3, %c0_4] : memref<32x1xf32, #tpu.memory_space<vmem>>, vector<32x1xf32>
    %3 = vector.extract_strided_slice %1 {offsets = [0, 0], sizes = [32, 1], strides = [1, 1]} : vector<32x2xf32> to vector<32x1xf32>
    %4 = vector.extract_strided_slice %0 {offsets = [0, 0], sizes = [1, 128], strides = [1, 1]} : vector<2x128xf32> to vector<1x128xf32>
    %5 = vector.broadcast %3 : vector<32x1xf32> to vector<32x128xf32>
    %6 = vector.broadcast %4 : vector<1x128xf32> to vector<32x128xf32>
    %7 = arith.mulf %5, %6 : vector<32x128xf32>
    %8 = vector.extract_strided_slice %1 {offsets = [0, 1], sizes = [32, 1], strides = [1, 1]} : vector<32x2xf32> to vector<32x1xf32>
    %9 = vector.extract_strided_slice %0 {offsets = [1, 0], sizes = [1, 128], strides = [1, 1]} : vector<2x128xf32> to vector<1x128xf32>
    %10 = vector.broadcast %8 : vector<32x1xf32> to vector<32x128xf32>
    %11 = vector.broadcast %9 : vector<1x128xf32> to vector<32x128xf32>
    %12 = arith.mulf %10, %11 : vector<32x128xf32>
    %13 = arith.addf %7, %12 : vector<32x128xf32>
    %14 = vector.broadcast %2 : vector<32x1xf32> to vector<32x128xf32>
    %15 = arith.addf %13, %14 : vector<32x128xf32>
    %16 = math.tanh %15 : vector<32x128xf32>
    %c0_5 = arith.constant 0 : index
    %c0_6 = arith.constant 0 : index
    %17 = vector.load %arg4[%c0_5, %c0_6] : memref<32x32xf32, #tpu.memory_space<vmem>>, vector<32x32xf32>
    %c0_7 = arith.constant 0 : index
    %c0_8 = arith.constant 0 : index
    %18 = vector.load %arg5[%c0_7, %c0_8] : memref<32x1xf32, #tpu.memory_space<vmem>>, vector<32x1xf32>
    %cst = arith.constant dense<0.000000e+00> : vector<32x128xf32>
    %19 = tpu.matmul %17, %16, %cst {dimension_numbers = #tpu.dot_dimension_numbers<[1], [0], [0], [1], [0, 0, 1, 1], [], []>} : vector<32x32xf32>, vector<32x128xf32>, vector<32x128xf32> -> vector<32x128xf32>
    %20 = vector.broadcast %18 : vector<32x1xf32> to vector<32x128xf32>
    %21 = arith.addf %19, %20 : vector<32x128xf32>
    %22 = math.tanh %21 : vector<32x128xf32>
    %c0_9 = arith.constant 0 : index
    %c0_10 = arith.constant 0 : index
    %23 = vector.load %arg6[%c0_9, %c0_10] : memref<32x32xf32, #tpu.memory_space<vmem>>, vector<32x32xf32>
    %c0_11 = arith.constant 0 : index
    %c0_12 = arith.constant 0 : index
    %24 = vector.load %arg7[%c0_11, %c0_12] : memref<32x1xf32, #tpu.memory_space<vmem>>, vector<32x1xf32>
    %cst_13 = arith.constant dense<0.000000e+00> : vector<32x128xf32>
    %25 = tpu.matmul %23, %22, %cst_13 {dimension_numbers = #tpu.dot_dimension_numbers<[1], [0], [0], [1], [0, 0, 1, 1], [], []>} : vector<32x32xf32>, vector<32x128xf32>, vector<32x128xf32> -> vector<32x128xf32>
    %26 = vector.broadcast %24 : vector<32x1xf32> to vector<32x128xf32>
    %27 = arith.addf %25, %26 : vector<32x128xf32>
    %28 = math.tanh %27 : vector<32x128xf32>
    %c0_14 = arith.constant 0 : index
    %c0_15 = arith.constant 0 : index
    %29 = vector.load %arg8[%c0_14, %c0_15] : memref<32x32xf32, #tpu.memory_space<vmem>>, vector<32x32xf32>
    %c0_16 = arith.constant 0 : index
    %c0_17 = arith.constant 0 : index
    %30 = vector.load %arg9[%c0_16, %c0_17] : memref<32x1xf32, #tpu.memory_space<vmem>>, vector<32x1xf32>
    %cst_18 = arith.constant dense<0.000000e+00> : vector<32x128xf32>
    %31 = tpu.matmul %29, %28, %cst_18 {dimension_numbers = #tpu.dot_dimension_numbers<[1], [0], [0], [1], [0, 0, 1, 1], [], []>} : vector<32x32xf32>, vector<32x128xf32>, vector<32x128xf32> -> vector<32x128xf32>
    %32 = vector.broadcast %30 : vector<32x1xf32> to vector<32x128xf32>
    %33 = arith.addf %31, %32 : vector<32x128xf32>
    %34 = math.tanh %33 : vector<32x128xf32>
    %c0_19 = arith.constant 0 : index
    %c0_20 = arith.constant 0 : index
    %35 = vector.load %arg10[%c0_19, %c0_20] : memref<1x32xf32, #tpu.memory_space<vmem>>, vector<1x32xf32>
    %c0_21 = arith.constant 0 : index
    %c0_22 = arith.constant 0 : index
    %36 = vector.load %arg11[%c0_21, %c0_22] : memref<1x1xf32, #tpu.memory_space<vmem>>, vector<1x1xf32>
    %cst_23 = arith.constant dense<0.000000e+00> : vector<1x128xf32>
    %37 = tpu.matmul %35, %34, %cst_23 {dimension_numbers = #tpu.dot_dimension_numbers<[1], [0], [0], [1], [0, 0, 1, 1], [], []>} : vector<1x32xf32>, vector<32x128xf32>, vector<1x128xf32> -> vector<1x128xf32>
    %38 = vector.broadcast %36 : vector<1x1xf32> to vector<1x128xf32>
    %39 = arith.addf %37, %38 : vector<1x128xf32>
    %c0_24 = arith.constant 0 : index
    %c0_25 = arith.constant 0 : index
    %40 = vector.load %arg12[%c0_24, %c0_25] : memref<1x128xf32, #tpu.memory_space<vmem>>, vector<1x128xf32>
    tpu.vector_store %arg12[%c0_24, %c0_25], %39 {strides = array<i32>} : memref<1x128xf32, #tpu.memory_space<vmem>>, vector<1x128xf32>,
    return
  }
  func.func @transform_0(%arg0: i32) -> (i32, i32) {
    %c0_i32 = arith.constant 0 : i32
    %c0_i32_0 = arith.constant 0 : i32
    return %c0_i32, %arg0 : i32, i32
  }
  func.func @transform_1(%arg0: i32) -> (i32, i32) {
    %c0_i32 = arith.constant 0 : i32
    %c0_i32_0 = arith.constant 0 : i32
    %c0_i32_1 = arith.constant 0 : i32
    return %c0_i32, %c0_i32_0 : i32, i32
  }
  func.func @transform_2(%arg0: i32) -> (i32, i32) {
    %c0_i32 = arith.constant 0 : i32
    %c0_i32_0 = arith.constant 0 : i32
    %c0_i32_1 = arith.constant 0 : i32
    return %c0_i32, %c0_i32_0 : i32, i32
  }
  func.func @transform_3(%arg0: i32) -> (i32, i32) {
    %c0_i32 = arith.constant 0 : i32
    %c0_i32_0 = arith.constant 0 : i32
    %c0_i32_1 = arith.constant 0 : i32
    return %c0_i32, %c0_i32_0 : i32, i32
  }
  func.func @transform_4(%arg0: i32) -> (i32, i32) {
    %c0_i32 = arith.constant 0 : i32
    %c0_i32_0 = arith.constant 0 : i32
    %c0_i32_1 = arith.constant 0 : i32
    return %c0_i32, %c0_i32_0 : i32, i32
  }
  func.func @transform_5(%arg0: i32) -> (i32, i32) {
    %c0_i32 = arith.constant 0 : i32
    %c0_i32_0 = arith.constant 0 : i32
    %c0_i32_1 = arith.constant 0 : i32
    return %c0_i32, %c0_i32_0 : i32, i32
  }
  func.func @transform_6(%arg0: i32) -> (i32, i32) {
    %c0_i32 = arith.constant 0 : i32
    %c0_i32_0 = arith.constant 0 : i32
    %c0_i32_1 = arith.constant 0 : i32
    return %c0_i32, %c0_i32_0 : i32, i32
  }
  func.func @transform_7(%arg0: i32) -> (i32, i32) {
    %c0_i32 = arith.constant 0 : i32
    %c0_i32_0 = arith.constant 0 : i32
    %c0_i32_1 = arith.constant 0 : i32
    return %c0_i32, %c0_i32_0 : i32, i32
  }
  func.func @transform_8(%arg0: i32) -> (i32, i32) {
    %c0_i32 = arith.constant 0 : i32
    %c0_i32_0 = arith.constant 0 : i32
    %c0_i32_1 = arith.constant 0 : i32
    return %c0_i32, %c0_i32_0 : i32, i32
  }
  func.func @transform_9(%arg0: i32) -> (i32, i32) {
    %c0_i32 = arith.constant 0 : i32
    %c0_i32_0 = arith.constant 0 : i32
    %c0_i32_1 = arith.constant 0 : i32
    return %c0_i32, %c0_i32_0 : i32, i32
  }
  func.func @transform_10(%arg0: i32) -> (i32, i32) {
    %c0_i32 = arith.constant 0 : i32
    %c0_i32_0 = arith.constant 0 : i32
    %c0_i32_1 = arith.constant 0 : i32
    return %c0_i32, %c0_i32_0 : i32, i32
  }
  func.func @transform_11(%arg0: i32) -> (i32, i32) {
    %c0_i32 = arith.constant 0 : i32
    %c0_i32_0 = arith.constant 0 : i32
    return %c0_i32, %arg0 : i32, i32
  }
}

</mosaic_0001>

<bundles_post_ra>
// kernel: tpu_custom_call.1
= control target key start
LH: loop header
LB: loop body
LE: loop exit
PB: predicated region body
PF: predicated region fallthrough
CT: control target
= control target key end

     0   :  { %s1018_s0 = inlined_call_operand.vmem [shape: f32[2,128], index: 0, kind: input, shape index: {}]   ;;  %s1019_s1 = inlined_call_operand.vmem [shape: f32[32,2], index: 1, kind: input, shape index: {}]   ;;  %s1020_s2 = inlined_call_operand.vmem [shape: f32[32,1], index: 2, kind: input, shape index: {}]   ;;  %s1021_s3 = inlined_call_operand.vmem [shape: f32[32,32], index: 3, kind: input, shape index: {}]   ;;  %s1022_s4 = inlined_call_operand.vmem [shape: f32[32,1], index: 4, kind: input, shape index: {}]   ;;  %s1023_s5 = inlined_call_operand.vmem [shape: f32[32,32], index: 5, kind: input, shape index: {}]   ;;  %s1024_s6 = inlined_call_operand.vmem [shape: f32[32,1], index: 6, kind: input, shape index: {}]   ;;  %s1025_s7 = inlined_call_operand.vmem [shape: f32[32,32], index: 7, kind: input, shape index: {}]   ;;  %s1026_s8 = inlined_call_operand.vmem [shape: f32[32,1], index: 8, kind: input, shape index: {}]   ;;  %s1027_s9 = inlined_call_operand.vmem [shape: f32[1,32], index: 9, kind: input, shape index: {}]   ;;  %s1028_s10 = inlined_call_operand.<no memory space> [shape: f32[1,1], index: 10, kind: input, shape index: {}]   ;;  %s1029_s11 = inlined_call_operand.hbm [shape: f32[1,128], index: 11, kind: output, shape index: {}]  }
   0x1   :  { %v16_v0 = vstv %s1028_s10 }
   0x2   :  { %17 = vst [vmem:[#allocation2] sm:$0x1] %v16_v0 }
   0x3   :  { %v44_v1 = vld [vmem:[%s1019_s1 + $0x10] sm:$0xff]  ;;  %v42_v2 = vld [vmem:[%s1019_s1] sm:$0xff]  ;;  %v814_v3 = vmov 1   ;;  %v43_v4 = vld [vmem:[%s1019_s1 + $0x8] sm:$0xff]  ;;  %v815_v5 = vmov 0  }
   0x4   :  { %754 = vset.pattern.permute.xlu0 %v814_v3  ;;  %752 = vset.pattern.permute.xlu1 %v814_v3 }
   0x5   :  { %87 = vperm.xlu0 %754, %v44_v1   ;;  %79 = vperm.xlu1 %752, %v42_v2  }
   0x9   :  { %755 = vset.pattern.permute.xlu0 %v815_v5  ;;  %83 = vperm.xlu1 %752, %v43_v4  }
   0xa   :  { %52 = vperm.xlu0 %755, %v42_v2  }
   0xb   :  { %18 = vsyncpa [#allocation4], 0  ;;  %v45_v6 = vld [vmem:[%s1019_s1 + $0x18] sm:$0xff]  ;;  %v47_v7 = vld [vmem:[%s1020_s2 + $0x8] sm:$0xff]  ;;  %vm162_vm0 = vcmask 261120   ;;  %v70_v25 = vlaneseq  ;;  %vm817_vm1 = vmmov 0  }
   0xc   :  { %v46_v8 = vld [vmem:[%s1020_s2] sm:$0xff]  ;;  %v48_v10 = vld [vmem:[%s1020_s2 + $0x10] sm:$0xff]  ;;  %v49_v12 = vld [vmem:[%s1020_s2 + $0x18] sm:$0xff]  ;;  %s819_s14 = smov [#allocation3]  }
   0xd   :  { %753 = vset.pattern.permute.xlu1 %v815_v5  ;;  %v138_v9 = vld [vmem:[%s1022_s4] sm:$0xff]  ;;  %v140_v11 = vld [vmem:[%s1022_s4 + $0x10] sm:$0xff]  ;;  %v139_v14 = vld [vmem:[%s1022_s4 + $0x8] sm:$0xff]  ;;  %v947_v28 = vshrl.u32 %v70_v25, 7  ;;  %s613_s15 = sshll.u32 %s819_s14, 4  ;;  %s614_s15 = int_to_ptr.vmem [resolvable:$true] %s613_s15 }
   0xe   :  { %57 = vperm.xlu0 %755, %v43_v4   ;;  %67 = vperm.xlu1 %753, %v45_v6   ;;  %v268_v13 = vld [vmem:[%s1024_s6] sm:$0xff]  ;;  %v270_v15 = vld [vmem:[%s1024_s6 + $0x10] sm:$0xff]  ;;  %v141_v16 = vld [vmem:[%s1022_s4 + $0x18] sm:$0xff]  ;;  %s790_s16 = scalar_lea.vmem %s614_s15, 16  ;;  %p795_p1 = scmp.lt.s32.totalorder %s614_s15, %s614_s15 }
   0xf   :  { %v397_v17 = vld [vmem:[%s1026_s8] sm:$0xff]  ;;  %v269_v18 = vld [vmem:[%s1024_s6 + $0x8] sm:$0xff]  ;;  %v399_v19 = vld [vmem:[%s1026_s8 + $0x10] sm:$0xff]  ;;  %v72_v31 = vsub.s32 0, %v947_v28  ;;  %v96_v32 = vsub.s32 1, %v947_v28  ;;  %p791_p0 = scmp.ne.s32.totalorder %s614_s15, %s790_s16 }
  0x10   :  { %v271_v20 = vld [vmem:[%s1024_s6 + $0x18] sm:$0xff]  ;;  %v523_v21 = vld [vmem:[#allocation2] sm:$0x1]  ;;  %v398_v22 = vld [vmem:[%s1026_s8 + $0x8] sm:$0xff]  ;;  %s794_s6 = scalar_lea.vmem %s614_s15, 32 }
  0x11   :  { %v134_v23 = vld [vmem:[%s1021_s3] sm:$0xff]  ;;  %v400_v24 = vld [vmem:[%s1026_s8 + $0x18] sm:$0xff]  ;;  %v135_v2 = vld [vmem:[%s1021_s3 + $0x8] sm:$0xff]  ;;  %p796_p2 = scmp.lt.s32.totalorder %s794_s6, %s790_s16 }
  0x12   :  { %62 = vperm.xlu0 %755, %v44_v1   ;;  %756 = vset.pattern.permute.xlu1 %v814_v3  ;;  %v41_v33 = vld [vmem:[%s1018_s0] sm:$0x3]  ;;  %v136_v3 = vld [vmem:[%s1021_s3 + $0x10] sm:$0xff]  ;;  %v137_v4 = vld [vmem:[%s1021_s3 + $0x18] sm:$0xff] }
  0x13   :  { %91 = vperm.xlu1 %756, %v45_v6   ;;  %671 = vmatprep.mubr.msk.f32.mxu0 %vm162_vm0, %v134_v23  ;;  %v73_v36 = vrot.slane %v41_v33, %v72_v31  ;;  %v97_v37 = vrot.slane %v41_v33, %v96_v32  ;;  %v266_v25 = vld [vmem:[%s1023_s5 + $0x10] sm:$0xff]  ;;  %p797_p3 = por %p796_p2, %p795_p1 }
  0x15   :  { %p798_p4 = pnand %p797_p3, %p791_p0 }
  0x16   :  { %113 = vperm.xlu0 %755, %v47_v7  }
  0x17   :  { %757 = vset.pattern.permute.xlu1 %v815_v5  ;;  %v264_v5 = vld [vmem:[%s1023_s5] sm:$0xff] }
  0x18   :  { %108 = vperm.xlu1 %757, %v46_v8   ;;  %685 = vmatprep.mubr.msk.f32.mxu1 %vm162_vm0, %v264_v5 }
  0x1a   :  { %144 = vperm.xlu0 %755, %v138_v9  }
  0x1c   :  { %118 = vperm.xlu1 %757, %v48_v10  }
  0x1e   :  { %154 = vperm.xlu0 %755, %v140_v11  }
  0x20   :  { %123 = vperm.xlu1 %757, %v49_v12  }
  0x22   :  { %274 = vperm.xlu0 %755, %v268_v13  }
  0x24   :  { %149 = vperm.xlu1 %757, %v139_v14  }
  0x26   :  { %284 = vperm.xlu0 %755, %v270_v15  }
  0x28   :  { %159 = vperm.xlu1 %757, %v141_v16  }
  0x2a   :  { %403 = vperm.xlu0 %755, %v397_v17  }
  0x2c   :  { %279 = vperm.xlu1 %757, %v269_v18  }
  0x2e   :  { %413 = vperm.xlu0 %755, %v399_v19  }
  0x30   :  { %289 = vperm.xlu1 %757, %v271_v20  }
  0x32   :  { %526 = vperm.xlu0 %755, %v523_v21  }
  0x34   :  { %408 = vperm.xlu1 %757, %v398_v22  }
  0x38   :  { %418 = vperm.xlu1 %757, %v400_v24   ;;  %v265_v24 = vld [vmem:[%s1023_s5 + $0x8] sm:$0xff] }
  0x84   :  { %v80_v26 = vpop.permute.xlu1 %79  ;;  %v88_v27 = vpop.permute.xlu0 %87 }
  0x85   :  { %v98_v43 = vmul.f32 %v97_v37, %v80_v26  ;;  %v100_v51 = vmul.f32 %v97_v37, %v88_v27  ;;  %v267_v26 = vld [vmem:[%s1023_s5 + $0x18] sm:$0xff]  ;;  %v393_v27 = vld [vmem:[%s1025_s7] sm:$0xff] }
  0x88   :  { %v84_v29 = vpop.permute.xlu1 %83 }
  0x89   :  { %v53_v30 = vpop.permute.xlu0 %52  ;;  %v99_v40 = vmul.f32 %v97_v37, %v84_v29 }
  0x8a   :  { %v74_v41 = vmul.f32 %v73_v36, %v53_v30 }
  0x8c   :  { %v102_v47 = vadd.f32 %v98_v43, %v74_v41 }
  0x8d   :  { %v58_v34 = vpop.permute.xlu0 %57  ;;  %v68_v35 = vpop.permute.xlu1 %67 }
  0x8e   :  { %v75_v38 = vmul.f32 %v73_v36, %v58_v34  ;;  %v77_v55 = vmul.f32 %v73_v36, %v68_v35 }
  0x90   :  { %v103_v44 = vadd.f32 %v99_v40, %v75_v38 }
  0x91   :  { %v63_v39 = vpop.permute.xlu0 %62 }
  0x92   :  { %v92_v42 = vpop.permute.xlu1 %91  ;;  %v76_v48 = vmul.f32 %v73_v36, %v63_v39 }
  0x93   :  { %v101_v52 = vmul.f32 %v97_v37, %v92_v42 }
  0x94   :  { %v104_v54 = vadd.f32 %v100_v51, %v76_v48  ;;  %v394_v48 = vld [vmem:[%s1025_s7 + $0x8] sm:$0xff]  ;;  %v816_v51 = vmov 0.0|0.0  }
  0x95   :  { %v114_v45 = vpop.permute.xlu0 %113  ;;  %v105_v57 = vadd.f32 %v101_v52, %v77_v55  ;;  %v818_v52 = vmov 0.0  }
  0x96   :  { %v127_v46 = vadd.f32 %v114_v45, %v103_v44 }
  0x97   :  { %v109_v49 = vpop.permute.xlu1 %108 }
  0x98   :  { %v126_v50 = vadd.f32 %v109_v49, %v102_v47  ;;  %758 = vtanh.f32 %v127_v46  ;;  %v395_v49 = vld [vmem:[%s1025_s7 + $0x10] sm:$0xff] }
  0x99   :  { %v145_v7 = vpop.permute.xlu0 %144 }
  0x9a   :  { %760 = vtanh.f32 %v126_v50  ;;  %v396_v50 = vld [vmem:[%s1025_s7 + $0x18] sm:$0xff] }
  0x9b   :  { %v119_v53 = vpop.permute.xlu1 %118 }
  0x9c   :  { %v128_v56 = vadd.f32 %v119_v53, %v104_v54 }
  0x9d   :  { %v155_v14 = vpop.permute.xlu0 %154 }
  0x9e   :  { %762 = vtanh.f32 %v128_v56 }
  0x9f   :  { %v124_v58 = vpop.permute.xlu1 %123 }
  0xa0   :  { %v129_v59 = vadd.f32 %v124_v58, %v105_v57 }
  0xa1   :  { %v275_v30 = vpop.permute.xlu0 %274 }
  0xa2   :  { %764 = vtanh.f32 %v129_v59  ;;  %v759_v60 = vpop.eup %758 }
  0xa3   :  { %v150_v6 = vpop.permute.xlu1 %149 }
  0xa4   :  { %v761_v61 = vpop.eup %760 }
  0xa5   :  { %v716_v62 = vpack.c.bf16 %v759_v60, %v761_v61  ;;  %v285_v38 = vpop.permute.xlu0 %284 }
  0xa7   :  { %717 = vmatprep.subr.bf16.mxu0 %v716_v62  ;;  %v160_v12 = vpop.permute.xlu1 %159 }
  0xa8   :  { %719 = vmatpush3.bf16.msra.mxu0 %v716_v62  ;;  %v763_v63 = vpop.eup %762 }
  0xa9   :  { %v404_v54 = vpop.permute.xlu0 %403 }
  0xab   :  { %v280_v29 = vpop.permute.xlu1 %279 }
  0xac   :  { %v765_v0 = vpop.eup %764 }
  0xad   :  { %v720_v1 = vpack.c.bf16 %v765_v0, %v763_v63  ;;  %v414_v61 = vpop.permute.xlu0 %413 }
  0xaf   :  { %721 = vmatprep.subr.bf16.mxu0 %v720_v1  ;;  %v290_v36 = vpop.permute.xlu1 %289 }
  0xb0   :  { %723 = vmatpush3.bf16.msra.mxu0 %v720_v1 }
  0xb3   :  { %672 = vmatmul.mubr.msk.f32.vlgmr.msra.gmra.mrb[0].mxu0 %vm162_vm0, %v135_v2  ;;  %v409_v53 = vpop.permute.xlu1 %408 }
  0xb4   :  { %674 = vmatprep.mubr.msk.f32.mxu0 %vm162_vm0, %v136_v3 }
  0xb7   :  { %675 = vmatmul.mubr.msk.f32.gmra.mrb[2].mxu0 %vm162_vm0, %v137_v4  ;;  %v419_v59 = vpop.permute.xlu1 %418 }
  0xb8   :  { %699 = vmatprep.mubr.msk.f32.mxu0 %vm162_vm0, %v393_v27 }
 0x186   :  { %v673_v8 = vpop.f32.mrb[0].mxu0 }
 0x187   :  { %v247_v9 = vadd.f32 %v673_v8, %v150_v6  ;;  %v241_v10 = vpop.f32.mrb[1].mxu0  ;;  %v527_v8 = vpop.permute.xlu0 %526 }
 0x188   :  { %v242_v11 = vadd.f32 %v241_v10, %v145_v7  ;;  %v522_v7 = vld [vmem:[%s1027_s9] sm:$0x1] }
 0x189   :  { %766 = vtanh.f32 %v247_v9  ;;  %v532_v9 = vrot.slane %v527_v8, %v72_v31 }
 0x18a   :  { %768 = vtanh.f32 %v242_v11  ;;  %v676_v13 = vpop.f32.mrb[2].mxu0 }
 0x18b   :  { %v257_v15 = vadd.f32 %v676_v13, %v160_v12  ;;  %v251_v16 = vpop.f32.mrb[3].mxu0 }
 0x18c   :  { %v252_v17 = vadd.f32 %v251_v16, %v155_v14 }
 0x18d   :  { %770 = vtanh.f32 %v257_v15 }
 0x18e   :  { %772 = vtanh.f32 %v252_v17 }
 0x193   :  { %v767_v18 = vpop.eup %766 }
 0x194   :  { %v769_v19 = vpop.eup %768 }
 0x195   :  { %v724_v20 = vpack.c.bf16 %v767_v18, %v769_v19 }
 0x197   :  { %v771_v21 = vpop.eup %770  ;;  %725 = vmatprep.subr.bf16.mxu1 %v724_v20 }
 0x198   :  { %v773_v22 = vpop.eup %772  ;;  %727 = vmatpush3.bf16.msra.mxu1 %v724_v20 }
 0x199   :  { %v728_v23 = vpack.c.bf16 %v771_v21, %v773_v22 }
 0x19b   :  { %729 = vmatprep.subr.bf16.mxu1 %v728_v23 }
 0x19c   :  { %731 = vmatpush3.bf16.msra.mxu1 %v728_v23 }
 0x19d   :  { %740 = vmatprep.subr.bf16.mxu1 %v816_v51 }
 0x19f   :  { %686 = vmatmul.mubr.msk.f32.vlgmr.msra.gmra.mrb[0].mxu1 %vm162_vm0, %v265_v24 }
 0x1a0   :  { %688 = vmatprep.mubr.msk.f32.mxu1 %vm162_vm0, %v266_v25 }
 0x1a3   :  { %689 = vmatmul.mubr.msk.f32.gmra.mrb[2].mxu1 %vm162_vm0, %v267_v26 }
 0x1a4   :  { %713 = vmatprep.mubr.msk.f32.mxu1 %vm817_vm1, %v818_v52 }
 0x272   :  { %v687_v32 = vpop.f32.mrb[0].mxu1 }
 0x273   :  { %v376_v33 = vadd.f32 %v687_v32, %v280_v29  ;;  %v370_v34 = vpop.f32.mrb[1].mxu1 }
 0x274   :  { %v371_v35 = vadd.f32 %v370_v34, %v275_v30 }
 0x275   :  { %774 = vtanh.f32 %v376_v33 }
 0x276   :  { %776 = vtanh.f32 %v371_v35  ;;  %v690_v37 = vpop.f32.mrb[2].mxu1 }
 0x277   :  { %v386_v39 = vadd.f32 %v690_v37, %v290_v36  ;;  %v380_v40 = vpop.f32.mrb[3].mxu1 }
 0x278   :  { %v381_v41 = vadd.f32 %v380_v40, %v285_v38 }
 0x279   :  { %778 = vtanh.f32 %v386_v39 }
 0x27a   :  { %780 = vtanh.f32 %v381_v41 }
 0x27f   :  { %v775_v42 = vpop.eup %774 }
 0x280   :  { %v777_v43 = vpop.eup %776 }
 0x281   :  { %v732_v44 = vpack.c.bf16 %v775_v42, %v777_v43 }
 0x283   :  { %v779_v45 = vpop.eup %778  ;;  %733 = vmatprep.subr.bf16.mxu0 %v732_v44 }
 0x284   :  { %v781_v46 = vpop.eup %780  ;;  %735 = vmatpush3.bf16.msra.mxu0 %v732_v44 }
 0x285   :  { %v736_v47 = vpack.c.bf16 %v779_v45, %v781_v46 }
 0x287   :  { %737 = vmatprep.subr.bf16.mxu0 %v736_v47 }
 0x288   :  { %739 = vmatpush3.bf16.msra.mxu0 %v736_v47 }
 0x28b   :  { %700 = vmatmul.mubr.msk.f32.vlgmr.msra.gmra.mrb[4].mxu0 %vm162_vm0, %v394_v48 }
 0x28c   :  { %702 = vmatprep.mubr.msk.f32.mxu0 %vm162_vm0, %v395_v49 }
 0x28f   :  { %703 = vmatmul.mubr.msk.f32.gmra.mrb[6].mxu0 %vm162_vm0, %v396_v50 }
 0x35e   :  { %v701_v55 = vpop.f32.mrb[4].mxu0 }
 0x35f   :  { %v505_v56 = vadd.f32 %v701_v55, %v409_v53  ;;  %v499_v57 = vpop.f32.mrb[5].mxu0 }
 0x360   :  { %v500_v58 = vadd.f32 %v499_v57, %v404_v54 }
 0x361   :  { %782 = vtanh.f32 %v505_v56 }
 0x362   :  { %784 = vtanh.f32 %v500_v58  ;;  %v704_v60 = vpop.f32.mrb[6].mxu0 }
 0x363   :  { %v515_v62 = vadd.f32 %v704_v60, %v419_v59  ;;  %v509_v63 = vpop.f32.mrb[7].mxu0 }
 0x364   :  { %v510_v0 = vadd.f32 %v509_v63, %v414_v61 }
 0x365   :  { %786 = vtanh.f32 %v515_v62 }
 0x366   :  { %788 = vtanh.f32 %v510_v0 }
 0x36b   :  { %v783_v1 = vpop.eup %782 }
 0x36c   :  { %v785_v2 = vpop.eup %784 }
 0x36d   :  { %v741_v3 = vpack.c.bf16 %v783_v1, %v785_v2 }
 0x36f   :  { %v787_v4 = vpop.eup %786  ;;  %742 = vmatpush3.bf16.msra.mxu1 %v741_v3 }
 0x370   :  { %v789_v5 = vpop.eup %788  ;;  %743 = vmatprep.subr.bf16.mxu1 %v816_v51 }
 0x371   :  { %v744_v6 = vpack.c.bf16 %v787_v4, %v789_v5 }
 0x373   :  { %745 = vmatpush3.bf16.msra.mxu1 %v744_v6 }
 0x376   :  { %714 = vmatmul.mubr.msk.f32.vlgmr.msra.gmra.mrb[4].mxu1 %vm162_vm0, %v522_v7 }
 0x449   :  { %v602_v10 = vpop.f32.mrb[4].mxu1 }
 0x44a   :  { %v603_v11 = vadd.f32 %v602_v10, %v532_v9  ;;  %v715_v12 = vpop.f32.mrb[5].mxu1 }
 0x44c   :  { %606 = vst [vmem:[#allocation3] sm:$0x1] %v603_v11 }
 0x44d   :  { %801 = shalt.err (!%p798_p4)
}
 0x44e   :  { %s802_s0 = scalar_lea.hbm %s1029_s11, 16 }
 0x44f   :  { %p803_p5 = scmp.ne.s32.totalorder %s1029_s11, %s802_s0  ;;  %p806_p6 = scmp.lt.u32.totalorder %s802_s0, %s1029_s11 }
 0x451   :  { %p808_p7 = pnand %p806_p6, %p803_p5 }
 0x453   :  { %811 = shalt.err (!%p808_p7)
}
 0x454   :  { %616 = dma.vmem_to_hbm [thread:$0]  %s614_s15, 16, %s1029_s11, [#allocation4]  }
 0x455   :  { %812 = dma.done.wait [#allocation4], 16  }
 0x456   :  { %813 = vsyncadd [#allocation4], 4294967280 }
 0x457   :  { %620 = vsyncpa [#allocation4], 1 }

</bundles_post_ra>
